<compile_context>
chip_gen: v6e
topology: v6e:2x2x1
jax: 0.10.0
libtpu: 0.0.40
codegen_flags: <defaults>
</compile_context>

<pallas_src>
import functools

import numpy as np
import jax
import jax.numpy as jnp
from jax import lax
from jax.experimental import pallas as pl
from jax.experimental.pallas import tpu as pltpu


def _interp_matrix(in_size, out_size):
    """1-D bilinear interpolation matrix matching F.interpolate(mode='bilinear',
    align_corners=False):  out = M @ in,  M shape (out, in)."""
    scale = in_size / out_size
    dst = np.arange(out_size, dtype=np.float64)
    src = np.maximum((dst + 0.5) * scale - 0.5, 0.0)
    i0 = np.minimum(np.floor(src).astype(np.int64), in_size - 1)
    i1 = np.minimum(i0 + 1, in_size - 1)
    w1 = src - i0
    w0 = 1.0 - w1
    m = np.zeros((out_size, in_size), np.float64)
    m[np.arange(out_size), i0] += w0
    m[np.arange(out_size), i1] += w1
    return m


def _head_kernel(q_ref, feat_ref, gamma_ref, beta_ref,
                 w1_ref, b1_ref, w2_ref, b2_ref, w3_ref, b3_ref,
                 ws_ref, bs_ref, wint_ref,
                 masks_ref, scores_ref, attn_ref,
                 me_scratch, *, nq, eps):
    b = pl.program_id(0)

    # ---- stage 0 (run once): LayerNorm + MLP + scores over ALL B*nq queries ----
    @pl.when(b == 0)
    def _():
        qf = q_ref[...]                                        # (B*nq, C) f32
        mu = jnp.mean(qf, axis=-1, keepdims=True)
        xc = qf - mu
        var = jnp.mean(xc * xc, axis=-1, keepdims=True)
        qn = xc * lax.rsqrt(var + eps) * gamma_ref[...] + beta_ref[...]

        h = jnp.maximum(jnp.dot(qn, w1_ref[...],
                                preferred_element_type=jnp.float32) + b1_ref[...], 0.0)
        h = jnp.maximum(jnp.dot(h, w2_ref[...],
                                preferred_element_type=jnp.float32) + b2_ref[...], 0.0)
        me = jnp.dot(h, w3_ref[...],
                     preferred_element_type=jnp.float32) + b3_ref[...]
        me_scratch[...] = me.astype(jnp.bfloat16)              # reused by all steps

        # score head (C -> 1): VPU mul + lane reduce; stored once per kernel.
        scores_ref[...] = jnp.sum(qn * ws_ref[...], axis=-1, keepdims=True) + bs_ref[...]

    # ---- per-batch: masks = mask_embed @ feat ; attn = masks @ resize ----
    start = b * nq
    if nq % 8 == 0:
        start = pl.multiple_of(start, 8)
    me_b = me_scratch[pl.ds(start, nq), :]                     # (nq, C) bf16

    masks = jnp.dot(me_b, feat_ref[0],                         # bf16 x bf16 -> f32
                    preferred_element_type=jnp.float32)        # (nq, HW)
    masks_ref[0] = masks

    attn_ref[0] = jnp.dot(masks.astype(jnp.bfloat16), wint_ref[...],
                          preferred_element_type=jnp.float32)  # (nq, A_pad)


def head_forward(q, mask_feature, attn_size, params, num_heads=8):
    """Pallas implementation of Head.forward.

    q: (B, nq, C); mask_feature: (B, C, H, W); attn_size: (AH, AW).
    params: ln_gamma/ln_beta (C,), w1/w2/w3 (C, C) stored (in, out), b1/b2/b3 (C,),
            score_w (C,), score_b scalar.
    """
    B, nq, C = q.shape
    _, Cf, H, W = mask_feature.shape
    assert Cf == C
    AH, AW = attn_size
    HW, A = H * W, AH * AW
    A_pad = ((A + 127) // 128) * 128                           # lane-dense attn output

    q2d = q.reshape(B * nq, C).astype(jnp.float32)             # folded M dimension
    feat = mask_feature.reshape(B, C, HW).astype(jnp.bfloat16)

    wint = np.kron(_interp_matrix(H, AH), _interp_matrix(W, AW)).T  # (HW, A)
    if A_pad > A:
        wint = np.pad(wint, ((0, 0), (0, A_pad - A)))
    wint = jnp.asarray(wint, jnp.bfloat16)

    as_row = lambda v: jnp.asarray(v, jnp.float32).reshape(1, -1)
    gamma, beta = as_row(params["ln_gamma"]), as_row(params["ln_beta"])
    w1 = jnp.asarray(params["w1"], jnp.float32)
    w2 = jnp.asarray(params["w2"], jnp.float32)
    w3 = jnp.asarray(params["w3"], jnp.float32)
    b1, b2, b3 = as_row(params["b1"]), as_row(params["b2"]), as_row(params["b3"])
    ws = as_row(params["score_w"])
    bs = jnp.asarray(params["score_b"], jnp.float32).reshape(1, 1)

    def const_spec(shape):                                     # fetched once, resident
        zeros = (0,) * len(shape)
        return pl.BlockSpec(shape, lambda b: zeros)

    per_b = lambda s1, s2: pl.BlockSpec((1, s1, s2), lambda b: (b, 0, 0))

    masks_flat, scores2d, attn_pad = pl.pallas_call(
        functools.partial(_head_kernel, nq=nq, eps=1e-5),
        grid=(B,),
        in_specs=[
            const_spec((B * nq, C)),                           # q (folded)
            per_b(C, HW),                                      # mask_feature (flattened)
            const_spec((1, C)), const_spec((1, C)),            # LN gamma, beta
            const_spec((C, C)), const_spec((1, C)),            # MLP w1, b1
            const_spec((C, C)), const_spec((1, C)),            # MLP w2, b2
            const_spec((C, C)), const_spec((1, C)),            # MLP w3, b3
            const_spec((1, C)), const_spec((1, 1)),            # score w, b
            const_spec((HW, A_pad)),                           # bilinear-resize matrix
        ],
        out_specs=[per_b(nq, HW),
                   const_spec((B * nq, 1)),
                   per_b(nq, A_pad)],
        out_shape=(jax.ShapeDtypeStruct((B, nq, HW), jnp.float32),
                   jax.ShapeDtypeStruct((B * nq, 1), jnp.float32),
                   jax.ShapeDtypeStruct((B, nq, A_pad), jnp.float32)),
        scratch_shapes=[pltpu.VMEM((B * nq, C), jnp.bfloat16)],
        # Grid steps share the stage-0 scratch -> "arbitrary".
        # TODO(synk): on v7x (2 TCs) split the heavy masks/resize part into a
        # separate parallel-grid call when B > 1 to use both cores.
        compiler_params=pltpu.CompilerParams(dimension_semantics=("arbitrary",)),
    )(q2d, feat, gamma, beta, w1, b1, w2, b2, w3, b3, ws, bs, wint)

    masks = masks_flat.reshape(B, nq, H, W)
    scores = scores2d.reshape(B, nq, 1)
    attn_logits = attn_pad[:, :, :A]
    # sigmoid(x) < 0.5, broadcast over heads, flatten(0,1)  (cheap elementwise tail)
    attn_mask = jax.nn.sigmoid(attn_logits) < 0.5
    attn_mask = jnp.broadcast_to(attn_mask[:, None], (B, num_heads, nq, A))
    attn_mask = attn_mask.reshape(B * num_heads, nq, A)
    return {"masks": masks, "scores": scores, "attn_mask": attn_mask,
            "attn_logits": attn_logits}


# ---------------- reference (numpy float64, torch semantics) ----------------
def head_ref(q, mask_feature, attn_size, params, num_heads):
    q = np.asarray(q, np.float64)
    feat = np.asarray(mask_feature, np.float64)
    B, nq, C = q.shape
    _, _, H, W = feat.shape
    AH, AW = attn_size
    g = np.asarray(params["ln_gamma"], np.float64)
    be = np.asarray(params["ln_beta"], np.float64)
    mu = q.mean(-1, keepdims=True)
    var = ((q - mu) ** 2).mean(-1, keepdims=True)
    qn = (q - mu) / np.sqrt(var + 1e-5) * g + be
    h = np.maximum(qn @ np.asarray(params["w1"], np.float64)
                   + np.asarray(params["b1"], np.float64), 0.0)
    h = np.maximum(h @ np.asarray(params["w2"], np.float64)
                   + np.asarray(params["b2"], np.float64), 0.0)
    me = h @ np.asarray(params["w3"], np.float64) + np.asarray(params["b3"], np.float64)
    scores = qn @ np.asarray(params["score_w"], np.float64)[:, None] + float(params["score_b"])
    masks = np.einsum("bqc,bchw->bqhw", me, feat)
    logits = np.zeros((B, nq, AH, AW), np.float64)
    for ah in range(AH):
        sy = max((ah + 0.5) * H / AH - 0.5, 0.0)
        y0 = min(int(np.floor(sy)), H - 1)
        y1 = min(y0 + 1, H - 1)
        ly = sy - y0
        for aw in range(AW):
            sx = max((aw + 0.5) * W / AW - 0.5, 0.0)
            x0 = min(int(np.floor(sx)), W - 1)
            x1 = min(x0 + 1, W - 1)
            lx = sx - x0
            logits[:, :, ah, aw] = ((1 - ly) * (1 - lx) * masks[:, :, y0, x0]
                                    + (1 - ly) * lx * masks[:, :, y0, x1]
                                    + ly * (1 - lx) * masks[:, :, y1, x0]
                                    + ly * lx * masks[:, :, y1, x1])
    logits = logits.reshape(B, nq, AH * AW)
    attn_mask = (1.0 / (1.0 + np.exp(-logits))) < 0.5
    attn_mask = np.broadcast_to(attn_mask[:, None], (B, num_heads, nq, AH * AW)).reshape(
        B * num_heads, nq, AH * AW)
    return {"masks": masks, "scores": scores, "attn_mask": attn_mask, "attn_logits": logits}


if __name__ == "__main__":
    B, nq, C = 2, 8, 128
    H = W = 16
    attn_size = (8, 8)
    num_heads = 8

    key = jax.random.PRNGKey(0)
    ks = jax.random.split(key, 12)
    xavier = lambda k, i, o: jax.random.uniform(
        k, (i, o), jnp.float32, -np.sqrt(6.0 / (i + o)), np.sqrt(6.0 / (i + o)))
    params = {
        "ln_gamma": 1.0 + 0.1 * jax.random.normal(ks[0], (C,), jnp.float32),
        "ln_beta": 0.1 * jax.random.normal(ks[1], (C,), jnp.float32),
        "w1": xavier(ks[2], C, C), "b1": 0.1 * jax.random.normal(ks[3], (C,), jnp.float32),
        "w2": xavier(ks[4], C, C), "b2": 0.1 * jax.random.normal(ks[5], (C,), jnp.float32),
        "w3": xavier(ks[6], C, C), "b3": 0.1 * jax.random.normal(ks[7], (C,), jnp.float32),
        "score_w": xavier(ks[8], C, 1)[:, 0],
        "score_b": jnp.float32(0.05),
    }
    q = jax.random.normal(ks[9], (B, nq, C), jnp.float32)
    mask_feature = jax.random.normal(ks[10], (B, C, H, W), jnp.float32)

    out = head_forward(q, mask_feature, attn_size, params, num_heads=num_heads)
    out = jax.block_until_ready(out)

    A = attn_size[0] * attn_size[1]
    assert out["masks"].shape == (B, nq, H, W)
    assert out["scores"].shape == (B, nq, 1)
    assert out["attn_mask"].shape == (B * num_heads, nq, A)
    assert out["attn_mask"].dtype == jnp.bool_

    ref = head_ref(q, mask_feature, attn_size, params, num_heads)
    # scores: full-f32 path, tight tolerance.
    np.testing.assert_allclose(np.asarray(out["scores"]), ref["scores"], rtol=2e-3, atol=2e-3)
    # masks / attn logits use bf16-input matmuls (f32 accumulation) -> looser tolerance.
    np.testing.assert_allclose(np.asarray(out["masks"]), ref["masks"], rtol=2e-2, atol=5e-2)
    np.testing.assert_allclose(np.asarray(out["attn_logits"]), ref["attn_logits"],
                               rtol=2e-2, atol=5e-2)
    # boolean attn_mask: compare away from the sigmoid==0.5 decision boundary
    safe = np.abs(ref["attn_logits"]) > 0.2
    km = np.asarray(out["attn_mask"]).reshape(B, num_heads, nq, A)[:, 0]
    rm = ref["attn_mask"].reshape(B, num_heads, nq, A)[:, 0]
    assert np.array_equal(km[safe], rm[safe])

    print("KERNEL_OK")
</pallas_src>

<mosaic_0001>
module attributes {stable_mosaic.version = 11 : i64} {
  func.func @_head_kernel(%arg0: i32, %arg1: memref<16x128xf32, #tpu.memory_space<vmem>>, %arg2: memref<1x128x256xbf16, #tpu.memory_space<vmem>>, %arg3: memref<1x128xf32, #tpu.memory_space<vmem>>, %arg4: memref<1x128xf32, #tpu.memory_space<vmem>>, %arg5: memref<128x128xf32, #tpu.memory_space<vmem>>, %arg6: memref<1x128xf32, #tpu.memory_space<vmem>>, %arg7: memref<128x128xf32, #tpu.memory_space<vmem>>, %arg8: memref<1x128xf32, #tpu.memory_space<vmem>>, %arg9: memref<128x128xf32, #tpu.memory_space<vmem>>, %arg10: memref<1x128xf32, #tpu.memory_space<vmem>>, %arg11: memref<1x128xf32, #tpu.memory_space<vmem>>, %arg12: memref<1x1xf32, #tpu.memory_space<vmem>>, %arg13: memref<256x128xbf16, #tpu.memory_space<vmem>>, %arg14: memref<1x8x256xf32, #tpu.memory_space<vmem>>, %arg15: memref<16x1xf32, #tpu.memory_space<vmem>>, %arg16: memref<1x8x128xf32, #tpu.memory_space<vmem>>, %arg17: memref<16x128xbf16, #tpu.memory_space<vmem>>) attributes {dimension_semantics = [#tpu.dimension_semantics<arbitrary>], iteration_bounds = array<i64: 2>, scalar_prefetch = 0 : i64, scratch_operands = 1 : i64, tpu.core_type = #tpu.core_type<tc>, window_params = [{pipeline_mode = #tpu.pipeline_mode<synchronous>, transform_indices = @transform_0, window_bounds = array<i64: 16, 128>}, {transform_indices = @transform_1, window_bounds = array<i64: 1, 128, 256>}, {pipeline_mode = #tpu.pipeline_mode<synchronous>, transform_indices = @transform_2, window_bounds = array<i64: 1, 128>}, {pipeline_mode = #tpu.pipeline_mode<synchronous>, transform_indices = @transform_3, window_bounds = array<i64: 1, 128>}, {pipeline_mode = #tpu.pipeline_mode<synchronous>, transform_indices = @transform_4, window_bounds = array<i64: 128, 128>}, {pipeline_mode = #tpu.pipeline_mode<synchronous>, transform_indices = @transform_5, window_bounds = array<i64: 1, 128>}, {pipeline_mode = #tpu.pipeline_mode<synchronous>, transform_indices = @transform_6, window_bounds = array<i64: 128, 128>}, {pipeline_mode = #tpu.pipeline_mode<synchronous>, transform_indices = @transform_7, window_bounds = array<i64: 1, 128>}, {pipeline_mode = #tpu.pipeline_mode<synchronous>, transform_indices = @transform_8, window_bounds = array<i64: 128, 128>}, {pipeline_mode = #tpu.pipeline_mode<synchronous>, transform_indices = @transform_9, window_bounds = array<i64: 1, 128>}, {pipeline_mode = #tpu.pipeline_mode<synchronous>, transform_indices = @transform_10, window_bounds = array<i64: 1, 128>}, {pipeline_mode = #tpu.pipeline_mode<synchronous>, transform_indices = @transform_11, window_bounds = array<i64: 1, 1>}, {pipeline_mode = #tpu.pipeline_mode<synchronous>, transform_indices = @transform_12, window_bounds = array<i64: 256, 128>}, {transform_indices = @transform_13, window_bounds = array<i64: 1, 8, 256>}, {pipeline_mode = #tpu.pipeline_mode<synchronous>, transform_indices = @transform_14, window_bounds = array<i64: 16, 1>}, {transform_indices = @transform_15, window_bounds = array<i64: 1, 8, 128>}]} {
    %c0_i32 = arith.constant 0 : i32
    %0 = arith.cmpi eq, %arg0, %c0_i32 : i32
    %1 = arith.extui %0 : i1 to i32
    %c0_i32_0 = arith.constant 0 : i32
    %2 = arith.cmpi ne, %1, %c0_i32_0 : i32
    scf.if %2 {
      %c0_13 = arith.constant 0 : index
      %c0_14 = arith.constant 0 : index
      %19 = vector.load %arg1[%c0_13, %c0_14] : memref<16x128xf32, #tpu.memory_space<vmem>>, vector<16x128xf32>
      %cst_15 = arith.constant dense<0.000000e+00> : vector<16xf32>
      %20 = vector.multi_reduction <add>, %19, %cst_15 [1] : vector<16x128xf32> to vector<16xf32>
      %21 = vector.shape_cast %20 : vector<16xf32> to vector<16x1xf32>
      %cst_16 = arith.constant 1.280000e+02 : f32
      %22 = vector.broadcast %cst_16 : f32 to vector<16x1xf32>
      %23 = arith.divf %21, %22 : vector<16x1xf32>
      %24 = vector.broadcast %23 : vector<16x1xf32> to vector<16x128xf32>
      %25 = arith.subf %19, %24 : vector<16x128xf32>
      %26 = arith.mulf %25, %25 : vector<16x128xf32>
      %cst_17 = arith.constant dense<0.000000e+00> : vector<16xf32>
      %27 = vector.multi_reduction <add>, %26, %cst_17 [1] : vector<16x128xf32> to vector<16xf32>
      %28 = vector.shape_cast %27 : vector<16xf32> to vector<16x1xf32>
      %cst_18 = arith.constant 1.280000e+02 : f32
      %29 = vector.broadcast %cst_18 : f32 to vector<16x1xf32>
      %30 = arith.divf %28, %29 : vector<16x1xf32>
      %cst_19 = arith.constant 9.99999974E-6 : f32
      %31 = vector.broadcast %cst_19 : f32 to vector<16x1xf32>
      %32 = arith.addf %30, %31 : vector<16x1xf32>
      %33 = math.rsqrt %32 : vector<16x1xf32>
      %34 = vector.broadcast %33 : vector<16x1xf32> to vector<16x128xf32>
      %35 = arith.mulf %25, %34 : vector<16x128xf32>
      %c0_20 = arith.constant 0 : index
      %c0_21 = arith.constant 0 : index
      %36 = vector.load %arg3[%c0_20, %c0_21] : memref<1x128xf32, #tpu.memory_space<vmem>>, vector<1x128xf32>
      %37 = vector.broadcast %36 : vector<1x128xf32> to vector<16x128xf32>
      %38 = arith.mulf %35, %37 : vector<16x128xf32>
      %c0_22 = arith.constant 0 : index
      %c0_23 = arith.constant 0 : index
      %39 = vector.load %arg4[%c0_22, %c0_23] : memref<1x128xf32, #tpu.memory_space<vmem>>, vector<1x128xf32>
      %40 = vector.broadcast %39 : vector<1x128xf32> to vector<16x128xf32>
      %41 = arith.addf %38, %40 : vector<16x128xf32>
      %c0_24 = arith.constant 0 : index
      %c0_25 = arith.constant 0 : index
      %42 = vector.load %arg5[%c0_24, %c0_25] : memref<128x128xf32, #tpu.memory_space<vmem>>, vector<128x128xf32>
      %cst_26 = arith.constant dense<0.000000e+00> : vector<16x128xf32>
      %43 = tpu.matmul %41, %42, %cst_26 {dimension_numbers = #tpu.dot_dimension_numbers<[1], [0], [0], [1], [0, 0, 1, 1], [], []>} : vector<16x128xf32>, vector<128x128xf32>, vector<16x128xf32> -> vector<16x128xf32>
      %c0_27 = arith.constant 0 : index
      %c0_28 = arith.constant 0 : index
      %44 = vector.load %arg6[%c0_27, %c0_28] : memref<1x128xf32, #tpu.memory_space<vmem>>, vector<1x128xf32>
      %45 = vector.broadcast %44 : vector<1x128xf32> to vector<16x128xf32>
      %46 = arith.addf %43, %45 : vector<16x128xf32>
      %cst_29 = arith.constant 0.000000e+00 : f32
      %47 = vector.broadcast %cst_29 : f32 to vector<16x128xf32>
      %48 = arith.maximumf %46, %47 : vector<16x128xf32>
      %c0_30 = arith.constant 0 : index
      %c0_31 = arith.constant 0 : index
      %49 = vector.load %arg7[%c0_30, %c0_31] : memref<128x128xf32, #tpu.memory_space<vmem>>, vector<128x128xf32>
      %cst_32 = arith.constant dense<0.000000e+00> : vector<16x128xf32>
      %50 = tpu.matmul %48, %49, %cst_32 {dimension_numbers = #tpu.dot_dimension_numbers<[1], [0], [0], [1], [0, 0, 1, 1], [], []>} : vector<16x128xf32>, vector<128x128xf32>, vector<16x128xf32> -> vector<16x128xf32>
      %c0_33 = arith.constant 0 : index
      %c0_34 = arith.constant 0 : index
      %51 = vector.load %arg8[%c0_33, %c0_34] : memref<1x128xf32, #tpu.memory_space<vmem>>, vector<1x128xf32>
      %52 = vector.broadcast %51 : vector<1x128xf32> to vector<16x128xf32>
      %53 = arith.addf %50, %52 : vector<16x128xf32>
      %cst_35 = arith.constant 0.000000e+00 : f32
      %54 = vector.broadcast %cst_35 : f32 to vector<16x128xf32>
      %55 = arith.maximumf %53, %54 : vector<16x128xf32>
      %c0_36 = arith.constant 0 : index
      %c0_37 = arith.constant 0 : index
      %56 = vector.load %arg9[%c0_36, %c0_37] : memref<128x128xf32, #tpu.memory_space<vmem>>, vector<128x128xf32>
      %cst_38 = arith.constant dense<0.000000e+00> : vector<16x128xf32>
      %57 = tpu.matmul %55, %56, %cst_38 {dimension_numbers = #tpu.dot_dimension_numbers<[1], [0], [0], [1], [0, 0, 1, 1], [], []>} : vector<16x128xf32>, vector<128x128xf32>, vector<16x128xf32> -> vector<16x128xf32>
      %c0_39 = arith.constant 0 : index
      %c0_40 = arith.constant 0 : index
      %58 = vector.load %arg10[%c0_39, %c0_40] : memref<1x128xf32, #tpu.memory_space<vmem>>, vector<1x128xf32>
      %59 = vector.broadcast %58 : vector<1x128xf32> to vector<16x128xf32>
      %60 = arith.addf %57, %59 : vector<16x128xf32>
      %61 = arith.truncf %60 : vector<16x128xf32> to vector<16x128xbf16>
      %c0_41 = arith.constant 0 : index
      %c0_42 = arith.constant 0 : index
      %62 = vector.load %arg17[%c0_41, %c0_42] : memref<16x128xbf16, #tpu.memory_space<vmem>>, vector<16x128xbf16>
      tpu.vector_store %arg17[%c0_41, %c0_42], %61 {strides = array<i32>} : memref<16x128xbf16, #tpu.memory_space<vmem>>, vector<16x128xbf16>,
      %c0_43 = arith.constant 0 : index
      %c0_44 = arith.constant 0 : index
      %63 = vector.load %arg11[%c0_43, %c0_44] : memref<1x128xf32, #tpu.memory_space<vmem>>, vector<1x128xf32>
      %64 = vector.broadcast %63 : vector<1x128xf32> to vector<16x128xf32>
      %65 = arith.mulf %41, %64 : vector<16x128xf32>
      %cst_45 = arith.constant dense<0.000000e+00> : vector<16xf32>
      %66 = vector.multi_reduction <add>, %65, %cst_45 [1] : vector<16x128xf32> to vector<16xf32>
      %67 = vector.shape_cast %66 : vector<16xf32> to vector<16x1xf32>
      %c0_46 = arith.constant 0 : index
      %c0_47 = arith.constant 0 : index
      %68 = vector.load %arg12[%c0_46, %c0_47] : memref<1x1xf32, #tpu.memory_space<vmem>>, vector<1x1xf32>
      %69 = vector.broadcast %68 : vector<1x1xf32> to vector<16x1xf32>
      %70 = arith.addf %67, %69 : vector<16x1xf32>
      %c0_48 = arith.constant 0 : index
      %c0_49 = arith.constant 0 : index
      %71 = vector.load %arg15[%c0_48, %c0_49] : memref<16x1xf32, #tpu.memory_space<vmem>>, vector<16x1xf32>
      tpu.vector_store %arg15[%c0_48, %c0_49], %70 {strides = array<i32>} : memref<16x1xf32, #tpu.memory_space<vmem>>, vector<16x1xf32>,
    } else {
    }
    %c8_i32 = arith.constant 8 : i32
    %3 = arith.muli %arg0, %c8_i32 : i32
    %4 = tpu.assume_multiple %3, 8 : i32
    %5 = arith.index_cast %4 : i32 to index
    %c0 = arith.constant 0 : index
    %6 = vector.load %arg17[%5, %c0] : memref<16x128xbf16, #tpu.memory_space<vmem>>, vector<8x128xbf16>
    %c0_1 = arith.constant 0 : index
    %c0_2 = arith.constant 0 : index
    %c0_3 = arith.constant 0 : index
    %7 = vector.load %arg2[%c0_1, %c0_2, %c0_3] : memref<1x128x256xbf16, #tpu.memory_space<vmem>>, vector<1x128x256xbf16>
    %8 = vector.shape_cast %7 : vector<1x128x256xbf16> to vector<128x256xbf16>
    %cst = arith.constant dense<0.000000e+00> : vector<8x256xf32>
    %9 = tpu.matmul %6, %8, %cst {dimension_numbers = #tpu.dot_dimension_numbers<[1], [0], [0], [1], [0, 0, 1, 1], [], []>} : vector<8x128xbf16>, vector<128x256xbf16>, vector<8x256xf32> -> vector<8x256xf32>
    %c0_4 = arith.constant 0 : index
    %c0_5 = arith.constant 0 : index
    %c0_6 = arith.constant 0 : index
    %10 = vector.load %arg14[%c0_4, %c0_5, %c0_6] : memref<1x8x256xf32, #tpu.memory_space<vmem>>, vector<1x8x256xf32>
    %11 = vector.shape_cast %10 : vector<1x8x256xf32> to vector<8x256xf32>
    %12 = vector.shape_cast %9 : vector<8x256xf32> to vector<1x8x256xf32>
    tpu.vector_store %arg14[%c0_4, %c0_5, %c0_6], %12 {strides = array<i32>} : memref<1x8x256xf32, #tpu.memory_space<vmem>>, vector<1x8x256xf32>,
    %13 = arith.truncf %9 : vector<8x256xf32> to vector<8x256xbf16>
    %c0_7 = arith.constant 0 : index
    %c0_8 = arith.constant 0 : index
    %14 = vector.load %arg13[%c0_7, %c0_8] : memref<256x128xbf16, #tpu.memory_space<vmem>>, vector<256x128xbf16>
    %cst_9 = arith.constant dense<0.000000e+00> : vector<8x128xf32>
    %15 = tpu.matmul %13, %14, %cst_9 {dimension_numbers = #tpu.dot_dimension_numbers<[1], [0], [0], [1], [0, 0, 1, 1], [], []>} : vector<8x256xbf16>, vector<256x128xbf16>, vector<8x128xf32> -> vector<8x128xf32>
    %c0_10 = arith.constant 0 : index
    %c0_11 = arith.constant 0 : index
    %c0_12 = arith.constant 0 : index
    %16 = vector.load %arg16[%c0_10, %c0_11, %c0_12] : memref<1x8x128xf32, #tpu.memory_space<vmem>>, vector<1x8x128xf32>
    %17 = vector.shape_cast %16 : vector<1x8x128xf32> to vector<8x128xf32>
    %18 = vector.shape_cast %15 : vector<8x128xf32> to vector<1x8x128xf32>
    tpu.vector_store %arg16[%c0_10, %c0_11, %c0_12], %18 {strides = array<i32>} : memref<1x8x128xf32, #tpu.memory_space<vmem>>, vector<1x8x128xf32>,
    return
  }
  func.func @transform_0(%arg0: i32) -> (i32, i32) {
    %c0_i32 = arith.constant 0 : i32
    %c0_i32_0 = arith.constant 0 : i32
    %c0_i32_1 = arith.constant 0 : i32
    return %c0_i32, %c0_i32_0 : i32, i32
  }
  func.func @transform_1(%arg0: i32) -> (i32, i32, i32) {
    %c0_i32 = arith.constant 0 : i32
    %c0_i32_0 = arith.constant 0 : i32
    %c0_i32_1 = arith.constant 0 : i32
    return %arg0, %c0_i32, %c0_i32_0 : i32, i32, i32
  }
  func.func @transform_2(%arg0: i32) -> (i32, i32) {
    %c0_i32 = arith.constant 0 : i32
    %c0_i32_0 = arith.constant 0 : i32
    %c0_i32_1 = arith.constant 0 : i32
    return %c0_i32, %c0_i32_0 : i32, i32
  }
  func.func @transform_3(%arg0: i32) -> (i32, i32) {
    %c0_i32 = arith.constant 0 : i32
    %c0_i32_0 = arith.constant 0 : i32
    %c0_i32_1 = arith.constant 0 : i32
    return %c0_i32, %c0_i32_0 : i32, i32
  }
  func.func @transform_4(%arg0: i32) -> (i32, i32) {
    %c0_i32 = arith.constant 0 : i32
    %c0_i32_0 = arith.constant 0 : i32
    %c0_i32_1 = arith.constant 0 : i32
    return %c0_i32, %c0_i32_0 : i32, i32
  }
  func.func @transform_5(%arg0: i32) -> (i32, i32) {
    %c0_i32 = arith.constant 0 : i32
    %c0_i32_0 = arith.constant 0 : i32
    %c0_i32_1 = arith.constant 0 : i32
    return %c0_i32, %c0_i32_0 : i32, i32
  }
  func.func @transform_6(%arg0: i32) -> (i32, i32) {
    %c0_i32 = arith.constant 0 : i32
    %c0_i32_0 = arith.constant 0 : i32
    %c0_i32_1 = arith.constant 0 : i32
    return %c0_i32, %c0_i32_0 : i32, i32
  }
  func.func @transform_7(%arg0: i32) -> (i32, i32) {
    %c0_i32 = arith.constant 0 : i32
    %c0_i32_0 = arith.constant 0 : i32
    %c0_i32_1 = arith.constant 0 : i32
    return %c0_i32, %c0_i32_0 : i32, i32
  }
  func.func @transform_8(%arg0: i32) -> (i32, i32) {
    %c0_i32 = arith.constant 0 : i32
    %c0_i32_0 = arith.constant 0 : i32
    %c0_i32_1 = arith.constant 0 : i32
    return %c0_i32, %c0_i32_0 : i32, i32
  }
  func.func @transform_9(%arg0: i32) -> (i32, i32) {
    %c0_i32 = arith.constant 0 : i32
    %c0_i32_0 = arith.constant 0 : i32
    %c0_i32_1 = arith.constant 0 : i32
    return %c0_i32, %c0_i32_0 : i32, i32
  }
  func.func @transform_10(%arg0: i32) -> (i32, i32) {
    %c0_i32 = arith.constant 0 : i32
    %c0_i32_0 = arith.constant 0 : i32
    %c0_i32_1 = arith.constant 0 : i32
    return %c0_i32, %c0_i32_0 : i32, i32
  }
  func.func @transform_11(%arg0: i32) -> (i32, i32) {
    %c0_i32 = arith.constant 0 : i32
    %c0_i32_0 = arith.constant 0 : i32
    %c0_i32_1 = arith.constant 0 : i32
    return %c0_i32, %c0_i32_0 : i32, i32
  }
  func.func @transform_12(%arg0: i32) -> (i32, i32) {
    %c0_i32 = arith.constant 0 : i32
    %c0_i32_0 = arith.constant 0 : i32
    %c0_i32_1 = arith.constant 0 : i32
    return %c0_i32, %c0_i32_0 : i32, i32
  }
  func.func @transform_13(%arg0: i32) -> (i32, i32, i32) {
    %c0_i32 = arith.constant 0 : i32
    %c0_i32_0 = arith.constant 0 : i32
    %c0_i32_1 = arith.constant 0 : i32
    return %arg0, %c0_i32, %c0_i32_0 : i32, i32, i32
  }
  func.func @transform_14(%arg0: i32) -> (i32, i32) {
    %c0_i32 = arith.constant 0 : i32
    %c0_i32_0 = arith.constant 0 : i32
    %c0_i32_1 = arith.constant 0 : i32
    return %c0_i32, %c0_i32_0 : i32, i32
  }
  func.func @transform_15(%arg0: i32) -> (i32, i32, i32) {
    %c0_i32 = arith.constant 0 : i32
    %c0_i32_0 = arith.constant 0 : i32
    %c0_i32_1 = arith.constant 0 : i32
    return %arg0, %c0_i32, %c0_i32_0 : i32, i32, i32
  }
}

</mosaic_0001>

<bundles_post_ra>
// kernel: tpu_custom_call.1
= control target key start
LH: loop header
LB: loop body
LE: loop exit
PB: predicated region body
PF: predicated region fallthrough
CT: control target
= control target key end

     0   :  { %s2575_s0 = inlined_call_operand.hbm [shape: f32[16,128], index: 0, kind: input, shape index: {}]   ;;  %s2576_s1 = inlined_call_operand.hbm [shape: bf16[2,128,256], index: 1, kind: input, shape index: {}]   ;;  %s2577_s2 = inlined_call_operand.vmem [shape: f32[1,128], index: 2, kind: input, shape index: {}]   ;;  %s2578_s3 = inlined_call_operand.vmem [shape: f32[1,128], index: 3, kind: input, shape index: {}]   ;;  %s2579_s4 = inlined_call_operand.hbm [shape: f32[128,128], index: 4, kind: input, shape index: {}]   ;;  %s2580_s5 = inlined_call_operand.vmem [shape: f32[1,128], index: 5, kind: input, shape index: {}]   ;;  %s2581_s6 = inlined_call_operand.hbm [shape: f32[128,128], index: 6, kind: input, shape index: {}]   ;;  %s2582_s7 = inlined_call_operand.vmem [shape: f32[1,128], index: 7, kind: input, shape index: {}]   ;;  %s2583_s8 = inlined_call_operand.hbm [shape: f32[128,128], index: 8, kind: input, shape index: {}]   ;;  %s2584_s9 = inlined_call_operand.vmem [shape: f32[1,128], index: 9, kind: input, shape index: {}]   ;;  %s2585_s10 = inlined_call_operand.vmem [shape: f32[1,128], index: 10, kind: input, shape index: {}]   ;;  %s2586_s11 = inlined_call_operand.<no memory space> [shape: f32[1,1], index: 11, kind: input, shape index: {}]   ;;  %s2587_s12 = inlined_call_operand.hbm [shape: bf16[256,128], index: 12, kind: input, shape index: {}]   ;;  %s2588_s13 = inlined_call_operand.hbm [shape: f32[2,8,256], index: 13, kind: output, shape index: {0}]   ;;  %s2589_s14 = inlined_call_operand.vmem [shape: f32[16,1], index: 14, kind: output, shape index: {1}]   ;;  %s2590_s15 = inlined_call_operand.hbm [shape: f32[2,8,128], index: 15, kind: output, shape index: {2}]  }
   0x1   :  { %2601 = sst [smem:[#allocation27_spill]] %s2575_s0  ;;  %v21_v0 = vstv %s2586_s11 }
   0x2   :  { %2602 = sst [smem:[#allocation28_spill]] %s2576_s1  ;;  %22 = vst [vmem:[#allocation3] sm:$0x1] %v21_v0 }
   0x3   :  { %2603 = sst [smem:[#allocation29_spill]] %s2579_s4 }
   0x4   :  { %2604 = sst [smem:[#allocation30_spill]] %s2581_s6 }
   0x5   :  { %2605 = sst [smem:[#allocation31_spill]] %s2583_s8 }
   0x6   :  { %2606 = sst [smem:[#allocation32_spill]] %s2588_s13 }
   0x7   :  { %2607 = sst [smem:[#allocation33_spill]] %s2590_s15 }
   0x8   :  { %23 = vsyncpa [#allocation5], 0 }
   0x9   :  { %24 = vsyncpa [#allocation8], 0 }
   0xa   :  { %26 = vsyncpa [#allocation8 + $0x1], 0 }
   0xb   :  { %27 = vsyncpa [#allocation11], 0 }
   0xc   :  { %28 = vsyncpa [#allocation14], 0 }
   0xd   :  { %29 = vsyncpa [#allocation6], 0 }
   0xe   :  { %31 = vsyncpa [#allocation6 + $0x1], 0 }
   0xf   :  { %32 = vsyncpa [#allocation17], 0 }
  0x10   :  { %34 = vsyncpa [#allocation17 + $0x1], 0  ;;  %s2264_s20 = smov 0   ;;  %s2266_s21 = smov 0  }
  0x11   :  { %s2268_s22 = smov 0   ;;  %s2270_s23 = smov 0  }
  0x12 LB: > { %2608 = sst [smem:[#allocation25_spill]] %s2154_s20  ;;  %s2285_s11 = sadd.s32 4294967295, %s2166_s23   ;;  %s2166_s23 = sphi %s2270_s23, %s2647_s23   ;;  %s2162_s22 = sphi %s2268_s22, %s2646_s22   ;;  %s2158_s21 = sphi %s2266_s21, %s2645_s21   ;;  %s2154_s20 = sphi %s2264_s20, %s2644_s20  }
  0x13   : > { %s1486_s24 = sadd.s32 4294967294, %s2166_s23   ;;  %p81_p0 = scmp.ne.s32.totalorder %s2158_s21, %s2154_s20 }
  0x14   : > { %p2594_p1 = scmp.eq.s32.totalorder %s2285_s11, 0  ;;  %p342_p3 = scmp.eq.s32.totalorder %s1486_s24, 1 }
  0x15   : > { %p1487_p5 = scmp.ge.s32.totalorder %s2166_s23, 1  ;;  %p396_p7 = scmp.lt.s32.totalorder %s2166_s23, 3 }
  0x16   : > { %p2294_p4 = por %p2594_p1, %p81_p0  ;;  %p2299_p6 = por %p342_p3, %p81_p0 }
  0x17   : > { %p2305_p9 = pnand %p1487_p5, %p396_p7  ;;  %s2168_s28 = smov [#allocation9]  }
  0x18   : > { %s2609_s25 = scalar_select %p2294_p4, 1, 0 }
  0x19   : > { %s2610_s26 = scalar_select %p2299_p6, 1, 0 }
  0x1a   : > { %s2612_s27 = scalar_select %p2305_p9, 1, 0 }
  0x1b   : > { %2611 = sst [smem:[#allocation26_spill]] %s2610_s26  ;;  %p1773_p11 = pneg %p2305_p9 }
  0x1c   : > { %s427_s29 = sshll.u32 %s2168_s28, 4  ;;  %s2169_s16 = smov [#allocation10]   ;;  %s428_s29 = int_to_ptr.vmem [resolvable:$true] %s427_s29 }
  0x1d   : > { %p2314_p12 = pnand %p1773_p11, %p2594_p1  ;;  %s443_s17 = sshll.u32 %s2169_s16, 4  ;;  %s444_s17 = int_to_ptr.vmem [resolvable:$true] %s443_s17 }
  0x1e   : > { %s2170_s18 = smov [#allocation4]   ;;  %s1909_s26 = scalar_lea.vmem %s428_s29, 2048 }
  0x1f   : > { %s408_s19 = sshll.u32 %s2170_s18, 4  ;;  %p2320_p13 = pneg %p2314_p12  ;;  %s409_s19 = int_to_ptr.vmem [resolvable:$true] %s408_s19 }
  0x20   : > { %p1910_p0 = scmp.ne.s32.totalorder %s428_s29, %s1909_s26  ;;  %p1917_p7 = scmp.lt.s32.totalorder %s428_s29, %s428_s29 }
  0x21   : > { %p1918_p11 = scmp.lt.s32.totalorder %s1909_s26, %s1909_s26 }
  0x22   : > { %p1912_p3 = pnand %p1910_p0, %p2320_p13 }
  0x23   : > { %p1919_p10 = por %p1918_p11, %p1917_p7 }
  0x24   : > { %p1913_p5 = pneg %p1912_p3 }
  0x26   : > { %p1920_p8 = pnand %p1919_p10, %p1913_p5 }
  0x28   : > { %1923 = shalt.err (!%p1920_p8)
}
  0x29   : > { %s2596_s28 = smov 128   ;;  %s2597_s16 = smov 8  }
  0x2a   : > { %s2615_s4 = sld [smem:[#allocation29_spill]]  ;;  %s1935_s15 = scalar_lea.vmem %s444_s17, 2048 }
  0x2b   : > { %p1936_p0 = scmp.ne.s32.totalorder %s444_s17, %s1935_s15  ;;  %p1943_p7 = scmp.lt.s32.totalorder %s444_s17, %s444_s17 }
  0x2c   : > { %p1944_p10 = scmp.lt.s32.totalorder %s1935_s15, %s1935_s15 }
  0x2d   : > { %p1938_p3 = pnand %p1936_p0, %p2320_p13 }
  0x2e   : > { %p1945_p8 = por %p1944_p10, %p1943_p7 }
  0x2f   : > { %p1939_p1 = pneg %p1938_p3 }
  0x30   : > { %1779 = dma.hbm_to_vmem [thread:$0]  (!%p2314_p12), %s2615_s4, 2048, %s428_s29, [#allocation8], %s2596_s28, %s2596_s28, %s2597_s16  }
  0x31   : > { %p1946_p5 = pnand %p1945_p8, %p1939_p1 }
  0x33   : > { %1949 = shalt.err (!%p1946_p5)
}
  0x34   : > { %s2616_s6 = sld [smem:[#allocation30_spill]]  ;;  %s1961_s20 = scalar_lea.vmem %s409_s19, 256 }
  0x35   : > { %p1962_p11 = scmp.ne.s32.totalorder %s409_s19, %s1961_s20  ;;  %p1969_p2 = scmp.lt.s32.totalorder %s409_s19, %s409_s19 }
  0x36   : > { %p1970_p7 = scmp.lt.s32.totalorder %s1961_s20, %s1961_s20 }
  0x37   : > { %p1964_p0 = pnand %p1962_p11, %p2320_p13 }
  0x38   : > { %p1971_p1 = por %p1970_p7, %p1969_p2 }
  0x39   : > { %p1965_p3 = pneg %p1964_p0 }
  0x3a   : > { %1782 = dma.hbm_to_vmem [thread:$0]  (!%p2314_p12), %s2616_s6, 2048, %s444_s17, [#allocation11], %s2596_s28, %s2596_s28, %s2597_s16  }
  0x3b   : > { %p1972_p10 = pnand %p1971_p1, %p1965_p3 }
  0x3d   : > { %1975 = shalt.err (!%p1972_p10)
}
  0x3e   : > { %s2617_s0 = sld [smem:[#allocation27_spill]]  ;;  %s2173_s29 = smov [#allocation12]  }
  0x3f   : > { %s459_s17 = sshll.u32 %s2173_s29, 4  ;;  %s2174_s18 = smov [#allocation13]   ;;  %s460_s17 = int_to_ptr.vmem [resolvable:$true] %s459_s17 }
  0x40   : > { %s481_s26 = sshll.u32 %s2174_s18, 4  ;;  %s1987_s4 = scalar_lea.vmem %s460_s17, 2048  ;;  %s482_s26 = int_to_ptr.vmem [resolvable:$true] %s481_s26 }
  0x41   : > { %p1988_p8 = scmp.ne.s32.totalorder %s460_s17, %s1987_s4  ;;  %p1995_p11 = scmp.lt.s32.totalorder %s460_s17, %s460_s17 }
  0x42   : > { %p1996_p0 = scmp.lt.s32.totalorder %s1987_s4, %s1987_s4 }
  0x43   : > { %p1990_p2 = pnand %p1988_p8, %p2320_p13 }
  0x44   : > { %1776 = dma.hbm_to_vmem [thread:$0]  (!%p2314_p12), %s2617_s0, 256, %s409_s19, [#allocation5], %s2596_s28, %s2596_s28, %s2597_s16  }
  0x45   : > { %p1991_p5 = pneg %p1990_p2  ;;  %p1997_p3 = por %p1996_p0, %p1995_p11 }
  0x47   : > { %p1998_p7 = pnand %p1997_p3, %p1991_p5 }
  0x49   : > { %2001 = shalt.err (!%p1998_p7)
}
  0x4a   : > { %s2618_s8 = sld [smem:[#allocation31_spill]]  ;;  %s2013_s15 = scalar_lea.vmem %s482_s26, 2048 }
  0x4b   : > { %p2014_p1 = scmp.ne.s32.totalorder %s482_s26, %s2013_s15  ;;  %p2021_p2 = scmp.lt.s32.totalorder %s482_s26, %s482_s26 }
  0x4c   : > { %p2022_p11 = scmp.lt.s32.totalorder %s2013_s15, %s2013_s15 }
  0x4d   : > { %p2016_p10 = pnand %p2014_p1, %p2320_p13 }
  0x4e   : > { %p2023_p5 = por %p2022_p11, %p2021_p2 }
  0x4f   : > { %p2017_p8 = pneg %p2016_p10 }
  0x50   : > { %1785 = dma.hbm_to_vmem [thread:$0]  (!%p2314_p12), %s2618_s8, 2048, %s460_s17, [#allocation11], %s2596_s28, %s2596_s28, %s2597_s16  }
  0x51   : > { %p2024_p0 = pnand %p2023_p5, %p2017_p8 }
  0x53   : > { %2027 = shalt.err (!%p2024_p0)
}
  0x54   : > { %s2175_s4 = smov 64   ;;  %s2176_s24 = smov 4  }
  0x55   : > { %1788 = dma.hbm_to_vmem [thread:$0]  (!%p2314_p12), %s2587_s12, 2048, %s482_s26, [#allocation14], %s2175_s4, %s2175_s4, %s2176_s24  }
  0x56   : > { %s2372_s17 = sadd.s32 1, %s2166_s23   ;;  %s68_s19 = sadd.s32 1, %s2162_s22 }
  0x57   : > { %s65_s18 = ssub.s32 %s2166_s23, %s2372_s17  ;;  %p75_p3 = scmp.ne.s32.totalorder %s2162_s22, %s2158_s21 }
  0x58   : > { %p66_p13 = scmp.eq.s32.totalorder %s65_s18, 0  ;;  %p76_p7 = scmp.eq.s32.totalorder %s2166_s23, 0 }
  0x59   : > { %p1805_p1 = scmp.lt.s32.totalorder %s2166_s23, 2  ;;  %p2619_p8 = scmp.eq.s32.totalorder %s2285_s11, 1 }
  0x5a   : > { %s2382_s20 = scalar_select %p66_p13, %s2162_s22, %s68_s19  }
  0x5b   : > { %p77_p10 = por %p76_p7, %p75_p3  ;;  %p2386_p2 = por %p2619_p8, %p75_p3 }
  0x5c   : > { %s495_s30 = sand.u32 1, %s2166_s23   ;;  %s497_s13 = sand.u32 1, %s2162_s22  }
  0x5d   : > { %s2620_s15 = scalar_select %p2386_p2, 1, 0 }
  0x5e   : > { %s1494_s26 = sshll.u32 %s497_s13, 7  ;;  %s1557_s4 = sshll.u32 %s2166_s23, 11 }
  0x5f   : > { %s2621_s1 = sld [smem:[#allocation28_spill]]  ;;  %s499_s18 = scalar_lea.vmem [#allocation7], %s1494_s26 }
  0x60   : > { %s506_s19 = sshll.u32 %s499_s18, 4  ;;  %p2400_p12 = pnand %p1805_p1, %p77_p10  ;;  %s2398_s19 = int_to_ptr.vmem [resolvable:$true] %s506_s19 }
  0x61   : > { %s2404_s0 = scalar_lea.sflag [#allocation8], %s495_s30 }
  0x62   : > { %p2030_p5 = pneg %p2400_p12 }
  0x65   : > { %s2396_s28 = scalar_lea.hbm %s2621_s1, %s1557_s4  ;;  %s2033_s26 = scalar_lea.hbm %s2621_s1, 4096 }
  0x66   : > { %s2028_s13 = scalar_lea.hbm %s2396_s28, 2048  ;;  %p2034_p3 = scmp.lt.s32.totalorder %s2396_s28, %s2621_s1 }
  0x67   : > { %p2029_p11 = scmp.ne.s32.totalorder %s2396_s28, %s2028_s13  ;;  %p2035_p7 = scmp.lt.s32.totalorder %s2033_s26, %s2028_s13 }
  0x69   : > { %p2031_p0 = pnand %p2030_p5, %p2029_p11  ;;  %p2036_p1 = por %p2035_p7, %p2034_p3 }
  0x6b   : > { %p2032_p13 = pneg %p2031_p0 }
  0x6d   : > { %p2037_p10 = pnand %p2036_p1, %p2032_p13 }
  0x6f   : > { %2040 = shalt.err (!%p2037_p10)
}
  0x70   : > { %s2041_s30 = scalar_lea.vmem %s2398_s19, 2048  ;;  %s2177_s6 = smov [#allocation7]  }
  0x71   : > { %p2042_p8 = scmp.ne.s32.totalorder %s2398_s19, %s2041_s30  ;;  %s2046_s8 = sshll.u32 %s2177_s6, 4  ;;  %s2047_s8 = int_to_ptr.vmem [resolvable:$false] %s2046_s8 }
  0x72   : > { %s2048_s4 = scalar_lea.vmem %s2047_s8, 4096  ;;  %p2049_p0 = scmp.lt.s32.totalorder %s2398_s19, %s2047_s8 }
  0x73   : > { %p2044_p6 = pnand %p2042_p8, %p2030_p5  ;;  %p2050_p2 = scmp.lt.s32.totalorder %s2048_s4, %s2041_s30 }
  0x75   : > { %p2045_p11 = pneg %p2044_p6  ;;  %p2051_p4 = por %p2050_p2, %p2049_p0 }
  0x77   : > { %p2052_p9 = pnand %p2051_p4, %p2045_p11 }
  0x79   : > { %2055 = shalt.err (!%p2052_p9)
}
  0x7a   : > { %s2623_s13 = smov 8   ;;  %s2624_s24 = smov 128  }
  0x7b   : > { %1792 = dma.hbm_to_vmem [thread:$0]  (!%p2400_p12), %s2396_s28, 2048, %s2398_s19, %s2404_s0, %s2624_s24, %s2624_s24, %s2623_s13  }
  0x7c   : > { %p2625_p6 = scmp.ne.s32.totalorder %s2612_s27, 0 }
  0x7d   : > { %p2626_p5 = scmp.eq.s32.totalorder (!%p2625_p6), %s2285_s11, 0 }
  0x7e   : > { %518 = sbr.rel (%p2625_p6) target bundleno = 1508 (0x5e4), region = 72 }
  0x83   : > { %2125 = dma.done.wait (%p2626_p5), [#allocation5], 256   ;;  %p2627_p13 = pmov %p2626_p5 }
  0x84   : > { %s524_s6 = sand.u32 1, %s2285_s11   ;;  %s2436_s8 = sand.u32 1, %s2158_s21  }
  0x85   : > { %2127 = vsyncadd (%p2627_p13), [#allocation5], 4294967040  ;;  %s1499_s16 = sshll.u32 %s2436_s8, 7  ;;  %s525_s26 = scalar_lea.sflag [#allocation8], %s524_s6 }
  0x86   : > { %s2439_s29 = scalar_lea.vmem [#allocation7], %s1499_s16  ;;  %p2628_p4 = scmp.ne.s32.totalorder %s2609_s25, 0 }
  0x88   : > { %2129 = dma.done.wait (%p2628_p4), %s525_s26, 2048  }
  0x89   : > { %2131 = vsyncadd (%p2628_p4), %s525_s26, 4294965248  ;;  %p2629_p9 = pmov %p2626_p5 }
  0x8a   : > { %p2630_p2 = pmov %p2626_p5 }
  0x8b   : > { %2133 = dma.done.wait (%p2629_p9), [#allocation8], 2048  }
  0x8c   : > { %2135 = vsyncadd (%p2630_p2), [#allocation8], 4294965248  ;;  %p2631_p12 = pmov %p2630_p2 }
  0x8d   : > { %p2632_p3 = pmov %p2630_p2 }
  0x8e   : > { %2137 = dma.done.wait (%p2631_p12), [#allocation11], 4096  }
  0x8f   : > { %2139 = vsyncadd (%p2632_p3), [#allocation11], 4294963200  ;;  %p2633_p7 = pmov %p2630_p2 }
  0x90   : > { %p2634_p1 = pmov %p2630_p2 }
  0x91   : > { %2141 = dma.done.wait (%p2633_p7), [#allocation14], 2048  }
  0x92   : > { %2143 = vsyncadd (%p2634_p1), [#allocation14], 4294965248  ;;  %s1504_s0 = sshll.u32 %s2436_s8, 4  ;;  %s1505_s25 = sshll.u32 %s2436_s8, 3 }
  0x93   : > { %s2459_s27 = scalar_lea.vmem [#allocation15], %s1504_s0  ;;  %s2461_s28 = scalar_lea.vmem [#allocation16], %s1505_s25 }
  0x94   : > { %p2635_p10 = scmp.ne.s32.totalorder %s2285_s11, 0 }
  0x96   : > { %600 = sbr.rel (%p2635_p10) target bundleno = 1066 (0x42a), region = 100 }
  0x9b   : > { %v601_v1 = vld [vmem:[#allocation4] sm:$0xff]  ;;  %v602_v2 = vld [vmem:[#allocation4 + $0x8] sm:$0xff]  ;;  %v657_v13 = vld [vmem:[#allocation9 + $0x68] sm:$0xff]  ;;  %vm974_vm0 = vcmask 7168  }
  0x9c   : > { %603 = vadd.xlane.f32.xlu0 %v601_v1  ;;  %v659_v3 = vld [vmem:[#allocation9 + $0x78] sm:$0xff]  ;;  %v658_v4 = vld [vmem:[#allocation9 + $0x70] sm:$0xff]  ;;  %v656_v14 = vld [vmem:[#allocation9 + $0x60] sm:$0xff] }
  0x9d   : > { %1642 = vmatprep.subr.mxu0 %v659_v3  ;;  %v655_v15 = vld [vmem:[#allocation9 + $0x58] sm:$0xff]  ;;  %v654_v16 = vld [vmem:[#allocation9 + $0x50] sm:$0xff]  ;;  %v653_v17 = vld [vmem:[#allocation9 + $0x48] sm:$0xff] }
  0x9e   : > { %1643 = vmatpush3.msra.mxu0 %v659_v3  ;;  %v652_v18 = vld [vmem:[#allocation9 + $0x40] sm:$0xff]  ;;  %v651_v19 = vld [vmem:[#allocation9 + $0x38] sm:$0xff]  ;;  %v650_v20 = vld [vmem:[#allocation9 + $0x30] sm:$0xff] }
  0x9f   : > { %1644 = vmatprep.subr.mxu0 %v658_v4  ;;  %v649_v21 = vld [vmem:[#allocation9 + $0x28] sm:$0xff]  ;;  %v648_v22 = vld [vmem:[#allocation9 + $0x20] sm:$0xff]  ;;  %v647_v23 = vld [vmem:[#allocation9 + $0x18] sm:$0xff] }
  0xa0   : > { %605 = vadd.xlane.f32.xlu0 %v602_v2  ;;  %1645 = vmatpush3.msra.mxu0 %v658_v4  ;;  %v646_v24 = vld [vmem:[#allocation9 + $0x10] sm:$0xff]  ;;  %v645_v25 = vld [vmem:[#allocation9 + $0x8] sm:$0xff]  ;;  %v644_v26 = vld [vmem:[#allocation9] sm:$0xff] }
  0xa1   : > { %1646 = vmatprep.subr.mxu0 %v657_v13  ;;  %v1507_v34 = vld [vmem:[%s2577_s2] ss:$0 sm:$0xff]  ;;  %v759_v46 = vld [vmem:[#allocation10 + $0x78] sm:$0xff]  ;;  %v758_v47 = vld [vmem:[#allocation10 + $0x70] sm:$0xff] }
  0xa2   : > { %1647 = vmatpush3.msra.mxu0 %v657_v13  ;;  %v1508_v36 = vld [vmem:[%s2578_s3] ss:$0 sm:$0xff]  ;;  %1677 = vmatprep.subr.mxu1 %v759_v46  ;;  %v757_v48 = vld [vmem:[#allocation10 + $0x68] sm:$0xff]  ;;  %v755_v50 = vld [vmem:[#allocation10 + $0x58] sm:$0xff] }
  0xa3   : > { %1648 = vmatprep.subr.mxu0 %v656_v14  ;;  %v1514_v39 = vld [vmem:[%s2585_s10] ss:$0 sm:$0xff]  ;;  %1678 = vmatpush3.msra.mxu1 %v759_v46  ;;  %v754_v51 = vld [vmem:[#allocation10 + $0x50] sm:$0xff]  ;;  %v753_v52 = vld [vmem:[#allocation10 + $0x48] sm:$0xff] }
  0xa4   : > { %1649 = vmatpush3.msra.mxu0 %v656_v14  ;;  %1679 = vmatprep.subr.mxu1 %v758_v47  ;;  %v756_v49 = vld [vmem:[#allocation10 + $0x60] sm:$0xff]  ;;  %v751_v54 = vld [vmem:[#allocation10 + $0x38] sm:$0xff]  ;;  %v750_v55 = vld [vmem:[#allocation10 + $0x30] sm:$0xff] }
  0xa5   : > { %1650 = vmatprep.subr.mxu0 %v655_v15  ;;  %1680 = vmatpush3.msra.mxu1 %v758_v47  ;;  %v752_v53 = vld [vmem:[#allocation10 + $0x40] sm:$0xff]  ;;  %v749_v56 = vld [vmem:[#allocation10 + $0x28] sm:$0xff]  ;;  %v747_v58 = vld [vmem:[#allocation10 + $0x18] sm:$0xff] }
  0xa6   : > { %1651 = vmatpush3.msra.mxu0 %v655_v15  ;;  %1681 = vmatprep.subr.mxu1 %v757_v48  ;;  %v748_v57 = vld [vmem:[#allocation10 + $0x20] sm:$0xff]  ;;  %v746_v59 = vld [vmem:[#allocation10 + $0x10] sm:$0xff]  ;;  %v745_v60 = vld [vmem:[#allocation10 + $0x8] sm:$0xff] }
  0xa7   : > { %1652 = vmatprep.subr.mxu0 %v654_v16  ;;  %1682 = vmatpush3.msra.mxu1 %v757_v48  ;;  %v744_v61 = vld [vmem:[#allocation10] sm:$0xff]  ;;  %v859_v62 = vld [vmem:[#allocation12 + $0x78] sm:$0xff]  ;;  %v858_v63 = vld [vmem:[#allocation12 + $0x70] sm:$0xff] }
  0xa8   : > { %1653 = vmatpush3.msra.mxu0 %v654_v16  ;;  %1683 = vmatprep.subr.mxu1 %v756_v49  ;;  %v857_v0 = vld [vmem:[#allocation12 + $0x68] sm:$0xff]  ;;  %v854_v3 = vld [vmem:[#allocation12 + $0x50] sm:$0xff]  ;;  %v1509_v15 = vld [vmem:[%s2580_s5] ss:$0 sm:$0xff] }
  0xa9   : > { %1654 = vmatprep.subr.mxu0 %v653_v17  ;;  %1684 = vmatpush3.msra.mxu1 %v756_v49  ;;  %v853_v4 = vld [vmem:[#allocation12 + $0x48] sm:$0xff] }
  0xaa   : > { %1655 = vmatpush3.msra.mxu0 %v653_v17  ;;  %1685 = vmatprep.subr.mxu1 %v755_v50 }
  0xab   : > { %1656 = vmatprep.subr.mxu0 %v652_v18  ;;  %1686 = vmatpush3.msra.mxu1 %v755_v50 }
  0xac   : > { %1657 = vmatpush3.msra.mxu0 %v652_v18  ;;  %1687 = vmatprep.subr.mxu1 %v754_v51 }
  0xad   : > { %1658 = vmatprep.subr.mxu0 %v651_v19  ;;  %1688 = vmatpush3.msra.mxu1 %v754_v51 }
  0xae   : > { %1659 = vmatpush3.msra.mxu0 %v651_v19  ;;  %1689 = vmatprep.subr.mxu1 %v753_v52 }
  0xaf   : > { %1660 = vmatprep.subr.mxu0 %v650_v20  ;;  %1690 = vmatpush3.msra.mxu1 %v753_v52 }
  0xb0   : > { %1661 = vmatpush3.msra.mxu0 %v650_v20  ;;  %1691 = vmatprep.subr.mxu1 %v752_v53 }
  0xb1   : > { %1662 = vmatprep.subr.mxu0 %v649_v21  ;;  %1692 = vmatpush3.msra.mxu1 %v752_v53 }
  0xb2   : > { %1663 = vmatpush3.msra.mxu0 %v649_v21  ;;  %1693 = vmatprep.subr.mxu1 %v751_v54 }
  0xb3   : > { %1664 = vmatprep.subr.mxu0 %v648_v22  ;;  %1694 = vmatpush3.msra.mxu1 %v751_v54 }
  0xb4   : > { %1665 = vmatpush3.msra.mxu0 %v648_v22  ;;  %1695 = vmatprep.subr.mxu1 %v750_v55  ;;  %v847_v22 = vld [vmem:[#allocation12 + $0x18] sm:$0xff] }
  0xb5   : > { %1666 = vmatprep.subr.mxu0 %v647_v23  ;;  %1696 = vmatpush3.msra.mxu1 %v750_v55 }
  0xb6   : > { %1667 = vmatpush3.msra.mxu0 %v647_v23  ;;  %1697 = vmatprep.subr.mxu1 %v749_v56  ;;  %v846_v23 = vld [vmem:[#allocation12 + $0x10] sm:$0xff] }
  0xb7   : > { %1668 = vmatprep.subr.mxu0 %v646_v24  ;;  %1698 = vmatpush3.msra.mxu1 %v749_v56 }
  0xb8   : > { %1669 = vmatpush3.msra.mxu0 %v646_v24  ;;  %1699 = vmatprep.subr.mxu1 %v748_v57  ;;  %v845_v24 = vld [vmem:[#allocation12 + $0x8] sm:$0xff] }
  0xb9   : > { %1670 = vmatprep.subr.mxu0 %v645_v25  ;;  %1700 = vmatpush3.msra.mxu1 %v748_v57 }
  0xba   : > { %1671 = vmatpush3.msra.mxu0 %v645_v25  ;;  %1701 = vmatprep.subr.mxu1 %v747_v58  ;;  %v844_v25 = vld [vmem:[#allocation12] sm:$0xff] }
  0xbb   : > { %1672 = vmatprep.subr.mxu0 %v644_v26  ;;  %1702 = vmatpush3.msra.mxu1 %v747_v58 }
  0xbc   : > { %1673 = vmatpush3.msra.mxu0 %v644_v26  ;;  %1703 = vmatprep.subr.mxu1 %v746_v59  ;;  %v1510_v26 = vld [vmem:[%s2582_s7] ss:$0 sm:$0xff] }
  0xbd   : > { %1704 = vmatpush3.msra.mxu1 %v746_v59  ;;  %1712 = vmatprep.subr.mxu0 %v859_v62 }
  0xbe   : > { %1705 = vmatprep.subr.mxu1 %v745_v60 }
  0xbf   : > { %1706 = vmatpush3.msra.mxu1 %v745_v60 }
  0xc0   : > { %1707 = vmatprep.subr.mxu1 %v744_v61 }
  0xc1   : > { %1708 = vmatpush3.msra.mxu1 %v744_v61 }
 0x125   : > { %v604_v5 = vpop.xlane.xlu0 %603 }
 0x126   : > { %v608_v6 = vmul.f32 0.0078125, %v604_v5  ;;  %v852_v5 = vld [vmem:[#allocation12 + $0x40] sm:$0xff] }
 0x128   : > { %v610_v7 = vsub.f32 %v601_v1, %v608_v6  ;;  %v856_v1 = vld [vmem:[#allocation12 + $0x60] sm:$0xff]  ;;  %v851_v6 = vld [vmem:[#allocation12 + $0x38] sm:$0xff] }
 0x129   : > { %v606_v8 = vpop.xlane.xlu0 %605 }
 0x12a   : > { %v609_v9 = vmul.f32 0.0078125, %v606_v8  ;;  %v612_v10 = vmul.f32 %v610_v7, %v610_v7  ;;  %v849_v8 = vld [vmem:[#allocation12 + $0x28] sm:$0xff] }
 0x12c   : > { %v611_v11 = vsub.f32 %v602_v2, %v609_v9  ;;  %614 = vadd.xlane.f32.xlu1 %v612_v10  ;;  %v855_v2 = vld [vmem:[#allocation12 + $0x58] sm:$0xff]  ;;  %v848_v9 = vld [vmem:[#allocation12 + $0x20] sm:$0xff]  ;;  %v1515_v10 = vld [vmem:[#allocation3] ss:$0 sm:$0xff] }
 0x12e   : > { %v613_v12 = vmul.f32 %v611_v11, %v611_v11 }
 0x130   : > { %616 = vadd.xlane.f32.xlu1 %v613_v12 }
 0x1b5   : > { %v615_v27 = vpop.xlane.xlu1 %614 }
 0x1b6   : > { %v618_v28 = vmul.f32 0.0078125, %v615_v27 }
 0x1b8   : > { %v620_v29 = vadd.f32 1e-05, %v618_v28 }
 0x1b9   : > { %v617_v30 = vpop.xlane.xlu1 %616 }
 0x1ba   : > { %1854 = vrsqrt.f32 %v620_v29  ;;  %v619_v31 = vmul.f32 0.0078125, %v617_v30 }
 0x1bc   : > { %v621_v32 = vadd.f32 1e-05, %v619_v31 }
 0x1be   : > { %1856 = vrsqrt.f32 %v621_v32 }
 0x1c7   : > { %v1855_v33 = vpop.eup %1854 }
 0x1c8   : > { %v624_v35 = vmul.f32 %v1855_v33, %v610_v7  ;;  %v850_v7 = vld [vmem:[#allocation12 + $0x30] sm:$0xff] }
 0x1ca   : > { %v633_v37 = vmul.f32 %v1507_v34, %v624_v35 }
 0x1cb   : > { %v1857_v38 = vpop.eup %1856 }
 0x1cc   : > { %v625_v40 = vmul.f32 %v1857_v38, %v611_v11  ;;  %v642_v41 = vadd.f32 %v1508_v36, %v633_v37 }
 0x1ce   : > { %v634_v42 = vmul.f32 %v1507_v34, %v625_v40  ;;  %1674 = vmatprep.mubr.f32.mxu0 %v642_v41  ;;  %v959_v43 = vmul.f32 %v1514_v39, %v642_v41  ;;  %v1511_v34 = vld [vmem:[%s2584_s9] ss:$0 sm:$0xff] }
 0x1d0   : > { %v643_v44 = vadd.f32 %v1508_v36, %v634_v42  ;;  %961 = vadd.xlane.f32.xlu0 %v959_v43 }
 0x1d2   : > { %1675 = vmatmul.mubr.f32.vlgmr.msra.gmra.mxu0 %v643_v44  ;;  %v960_v45 = vmul.f32 %v1514_v39, %v643_v44 }
 0x1d3   : > { %1713 = vmatpush3.msra.mxu0 %v859_v62 }
 0x1d4   : > { %963 = vadd.xlane.f32.xlu1 %v960_v45  ;;  %1714 = vmatprep.subr.mxu0 %v858_v63 }
 0x1d5   : > { %1715 = vmatpush3.msra.mxu0 %v858_v63 }
 0x1d6   : > { %1716 = vmatprep.subr.mxu0 %v857_v0 }
 0x1d7   : > { %1717 = vmatpush3.msra.mxu0 %v857_v0 }
 0x1d8   : > { %1718 = vmatprep.subr.mxu0 %v856_v1 }
 0x1d9   : > { %1719 = vmatpush3.msra.mxu0 %v856_v1 }
 0x1da   : > { %1720 = vmatprep.subr.mxu0 %v855_v2 }
 0x1db   : > { %1721 = vmatpush3.msra.mxu0 %v855_v2 }
 0x1dc   : > { %1722 = vmatprep.subr.mxu0 %v854_v3 }
 0x1dd   : > { %1723 = vmatpush3.msra.mxu0 %v854_v3 }
 0x1de   : > { %1724 = vmatprep.subr.mxu0 %v853_v4 }
 0x1df   : > { %1725 = vmatpush3.msra.mxu0 %v853_v4 }
 0x1e0   : > { %1726 = vmatprep.subr.mxu0 %v852_v5 }
 0x1e1   : > { %1727 = vmatpush3.msra.mxu0 %v852_v5 }
 0x1e2   : > { %1728 = vmatprep.subr.mxu0 %v851_v6 }
 0x1e3   : > { %1729 = vmatpush3.msra.mxu0 %v851_v6 }
 0x1e4   : > { %1730 = vmatprep.subr.mxu0 %v850_v7 }
 0x1e5   : > { %1731 = vmatpush3.msra.mxu0 %v850_v7 }
 0x1e6   : > { %1732 = vmatprep.subr.mxu0 %v849_v8 }
 0x1e7   : > { %1733 = vmatpush3.msra.mxu0 %v849_v8 }
 0x1e8   : > { %1734 = vmatprep.subr.mxu0 %v848_v9 }
 0x1e9   : > { %1735 = vmatpush3.msra.mxu0 %v848_v9 }
 0x1ea   : > { %1736 = vmatprep.subr.mxu0 %v847_v22 }
 0x1eb   : > { %1737 = vmatpush3.msra.mxu0 %v847_v22 }
 0x1ec   : > { %1738 = vmatprep.subr.mxu0 %v846_v23 }
 0x1ed   : > { %1739 = vmatpush3.msra.mxu0 %v846_v23 }
 0x1ee   : > { %1740 = vmatprep.subr.mxu0 %v845_v24 }
 0x1ef   : > { %1741 = vmatpush3.msra.mxu0 %v845_v24 }
 0x1f0   : > { %1742 = vmatprep.subr.mxu0 %v844_v25 }
 0x1f1   : > { %1743 = vmatpush3.msra.mxu0 %v844_v25 }
 0x259   : > { %v962_v11 = vpop.xlane.xlu0 %961 }
 0x25a   : > { %v972_v12 = vadd.f32 %v1515_v10, %v962_v11 }
 0x25c   : > { %975 = vst.msk [vmem:[%s2589_s14] sm:$0xff] %vm974_vm0, %v972_v12 }
 0x25d   : > { %v964_v13 = vpop.xlane.xlu1 %963 }
 0x25e   : > { %v973_v14 = vadd.f32 %v1515_v10, %v964_v13 }
 0x260   : > { %976 = vst.msk [vmem:[%s2589_s14 + $0x8] sm:$0xff] %vm974_vm0, %v973_v14 }
 0x292   : > { %v1676_v16 = vpop.f32.mrf.mxu0 }
 0x293   : > { %v739_v17 = vadd.f32 %v1676_v16, %v1509_v15 }
 0x294   : > { %v733_v18 = vpop.f32.mrf.mxu0 }
 0x295   : > { %v734_v19 = vadd.f32 %v1509_v15, %v733_v18  ;;  %v743_v21 = vmax.f32 %v739_v17, 0.0 }
 0x297   : > { %v742_v20 = vmax.f32 %v734_v19, 0.0 }
 0x299   : > { %1709 = vmatprep.mubr.f32.mxu1 %v742_v20 }
 0x29a   : > { %1710 = vmatmul.mubr.f32.vlgmr.msra.gmra.mxu1 %v743_v21 }
 0x35a   : > { %v1711_v27 = vpop.f32.mrf.mxu1 }
 0x35b   : > { %v839_v28 = vadd.f32 %v1711_v27, %v1510_v26 }
 0x35c   : > { %v833_v29 = vpop.f32.mrf.mxu1 }
 0x35d   : > { %v834_v30 = vadd.f32 %v1510_v26, %v833_v29  ;;  %v843_v32 = vmax.f32 %v839_v28, 0.0 }
 0x35f   : > { %v842_v31 = vmax.f32 %v834_v30, 0.0 }
 0x361   : > { %1744 = vmatprep.mubr.f32.mxu0 %v842_v31 }
 0x362   : > { %1745 = vmatmul.mubr.f32.vlgmr.msra.gmra.mxu0 %v843_v32 }
 0x422   : > { %v1746_v33 = vpop.f32.mrf.mxu0 }
 0x423   : > { %v939_v36 = vadd.f32 %v1746_v33, %v1511_v34 }
 0x424   : > { %v933_v35 = vpop.f32.mrf.mxu0 }
 0x425   : > { %v934_v37 = vadd.f32 %v1511_v34, %v933_v35 }
 0x427   : > { %v1564_v38 = vpack.c.bf16 %v939_v36, %v934_v37 }
 0x429   : > { %1565 = vst [vmem:[#allocation2] sm:$0xff] %v1564_v38  }
 0x42a PF: > { %v1858_v39 = vld [vmem:[%s2439_s29 + $0x74] ss:$8 sps:$4 sm:$0xff]   ;;  %v1860_v40 = vld [vmem:[%s2439_s29 + $0x70] ss:$8 sps:$4 sm:$0xff]   ;;  %v2178_v41 = vmov 0   ;;  %s1516_s24 = sshll.u32 %s2285_s11, 3 }
 0x42b   : > { %1111 = vmatprep.mubr.bf16.mxu0 %v2178_v41  ;;  %1079 = vmatprep.subr.bf16.mxu0 %v1858_v39  ;;  %v1861_v42 = vld [vmem:[%s2439_s29 + $0x64] ss:$8 sps:$4 sm:$0xff]   ;;  %v1863_v43 = vld [vmem:[%s2439_s29 + $0x60] ss:$8 sps:$4 sm:$0xff]   ;;  %v1864_v44 = vld [vmem:[%s2439_s29 + $0x54] ss:$8 sps:$4 sm:$0xff]  }
 0x42c   : > { %1080 = vmatpush1.bf16.msra.mxu0 %v1860_v40  ;;  %v1866_v45 = vld [vmem:[%s2439_s29 + $0x50] ss:$8 sps:$4 sm:$0xff]   ;;  %v1867_v46 = vld [vmem:[%s2439_s29 + $0x44] ss:$8 sps:$4 sm:$0xff]   ;;  %v1869_v47 = vld [vmem:[%s2439_s29 + $0x40] ss:$8 sps:$4 sm:$0xff]  }
 0x42d   : > { %1081 = vmatprep.subr.bf16.mxu0 %v1861_v42  ;;  %v1870_v48 = vld [vmem:[%s2439_s29 + $0x34] ss:$8 sps:$4 sm:$0xff]   ;;  %v1872_v51 = vld [vmem:[%s2439_s29 + $0x30] ss:$8 sps:$4 sm:$0xff]   ;;  %v1886_v54 = vld [vmem:[#allocation13 + $0x68] sm:$0xff]   ;;  %s978_s6 = sshra.s32 %s1516_s24, 3 }
 0x42e   : > { %v1882_v49 = vld [vmem:[#allocation13 + $0x78] sm:$0xff]   ;;  %v1884_v52 = vld [vmem:[#allocation13 + $0x70] sm:$0xff]   ;;  %v1873_v55 = vld [vmem:[%s2439_s29 + $0x24] ss:$8 sps:$4 sm:$0xff]   ;;  %s1517_s16 = sshll.u32 %s978_s6, 2  ;;  %s1313_s0 = sshll.u32 %s2459_s27, 4  ;;  %s1314_s0 = int_to_ptr.vmem [resolvable:$true] %s1313_s0 }
 0x42f   : > { %v1883_v50 = vld [vmem:[#allocation13 + $0x38] sm:$0xff]   ;;  %1620 = vmatprep.subr.bf16.mxu1 %v1882_v49  ;;  %v1885_v53 = vld [vmem:[#allocation13 + $0x30] sm:$0xff]   ;;  %v1875_v56 = vld [vmem:[%s2439_s29 + $0x20] ss:$8 sps:$4 sm:$0xff]   ;;  %s981_s26 = scalar_lea.vmem [#allocation2], %s1517_s16  ;;  %s2636_s18 = sld [smem:[#allocation32_spill]] }
 0x430   : > { %1082 = vmatpush1.bf16.msra.mxu0 %v1863_v43  ;;  %1621 = vmatpush3.bf16.msra.mxu1 %v1883_v50  ;;  %v1887_v57 = vld [vmem:[#allocation13 + $0x28] sm:$0xff]   ;;  %v1888_v58 = vld [vmem:[#allocation13 + $0x60] sm:$0xff]   ;;  %v1876_v59 = vld [vmem:[%s2439_s29 + $0x14] ss:$8 sps:$4 sm:$0xff]   ;;  %s1294_s4 = scalar_lea.sflag [#allocation6], %s2436_s8  ;;  %s2056_s13 = scalar_lea.vmem %s1314_s0, 256 }
 0x431   : > { %1083 = vmatprep.subr.bf16.mxu0 %v1864_v44  ;;  %1622 = vmatprep.subr.bf16.mxu1 %v1884_v52  ;;  %v1878_v60 = vld [vmem:[%s2439_s29 + $0x10] ss:$8 sps:$4 sm:$0xff]   ;;  %v1889_v61 = vld [vmem:[#allocation13 + $0x20] sm:$0xff]   ;;  %v1894_v5 = vld [vmem:[#allocation13 + $0x48] sm:$0xff]   ;;  %p2057_p8 = scmp.ne.s32.totalorder %s1314_s0, %s2056_s13  ;;  %p2637_p11 = scmp.ne.s32.totalorder %s2620_s15, 0 }
 0x432   : > { %v1890_v62 = vld [vmem:[#allocation13 + $0x58] sm:$0xff]   ;;  %v1879_v63 = vld [vmem:[%s2439_s29 + $0x4] ss:$8 sps:$4 sm:$0xff]   ;;  %v1881_v1 = vld [vmem:[%s2439_s29] ss:$8 sps:$4 sm:$0xff]   ;;  %s1560_s29 = sshll.u32 %s2285_s11, 8 }
 0x433   : > { %v1891_v0 = vld [vmem:[#allocation13 + $0x18] sm:$0xff]   ;;  %v1892_v2 = vld [vmem:[#allocation13 + $0x50] sm:$0xff]   ;;  %v982_v4 = vld [vmem:[%s981_s26] sm:$0xf]  ;;  %p2058_p0 = pnand %p2057_p8, %p2637_p11  ;;  %s2179_s24 = smov [#allocation15]  }
 0x434   : > { %1084 = vmatpush1.bf16.msra.mxu0 %v1866_v45  ;;  %1623 = vmatpush3.bf16.msra.mxu1 %v1885_v53  ;;  %v1893_v3 = vld [vmem:[#allocation13 + $0x10] sm:$0xff]   ;;  %v1895_v6 = vld [vmem:[#allocation13 + $0x8] sm:$0xff]   ;;  %v1896_v7 = vld [vmem:[#allocation13 + $0x40] sm:$0xff]   ;;  %s2060_s6 = sshll.u32 %s2179_s24, 4  ;;  %s2061_s6 = int_to_ptr.vmem [resolvable:$false] %s2060_s6 }
 0x435   : > { %1085 = vmatprep.subr.bf16.mxu0 %v1867_v46  ;;  %1624 = vmatprep.subr.bf16.mxu1 %v1886_v54  ;;  %v1897_v8 = vld [vmem:[#allocation13] sm:$0xff]   ;;  %s1311_s30 = scalar_lea.hbm %s2636_s18, %s1560_s29  ;;  %p2059_p6 = pneg %p2058_p0 }
 0x436   : > { %s2062_s16 = scalar_lea.vmem %s2061_s6, 512  ;;  %p2063_p5 = scmp.lt.s32.totalorder %s1314_s0, %s2061_s6 }
 0x437   : > { %p2064_p13 = scmp.lt.s32.totalorder %s2062_s16, %s2056_s13 }
 0x438   : > { %1086 = vmatpush1.bf16.msra.mxu0 %v1869_v47  ;;  %1625 = vmatpush3.bf16.msra.mxu1 %v1887_v57 }
 0x439   : > { %1087 = vmatprep.subr.bf16.mxu0 %v1870_v48  ;;  %1626 = vmatprep.subr.bf16.mxu1 %v1888_v58  ;;  %p2065_p4 = por %p2064_p13, %p2063_p5 }
 0x43b   : > { %p2066_p9 = pnand %p2065_p4, %p2059_p6 }
 0x43c   : > { %1088 = vmatpush1.bf16.msra.mxu0 %v1872_v51  ;;  %1627 = vmatpush3.bf16.msra.mxu1 %v1889_v61 }
 0x43d   : > { %1089 = vmatprep.subr.bf16.mxu0 %v1873_v55  ;;  %1628 = vmatprep.subr.bf16.mxu1 %v1890_v62 }
 0x440   : > { %1090 = vmatpush1.bf16.msra.mxu0 %v1875_v56  ;;  %1629 = vmatpush3.bf16.msra.mxu1 %v1891_v0 }
 0x441   : > { %1091 = vmatprep.subr.bf16.mxu0 %v1876_v59  ;;  %1630 = vmatprep.subr.bf16.mxu1 %v1892_v2 }
 0x444   : > { %1092 = vmatpush1.bf16.msra.mxu0 %v1878_v60  ;;  %1631 = vmatpush3.bf16.msra.mxu1 %v1893_v3 }
 0x445   : > { %1093 = vmatprep.subr.bf16.mxu0 %v1879_v63  ;;  %1632 = vmatprep.subr.bf16.mxu1 %v1894_v5 }
 0x448   : > { %1094 = vmatpush1.bf16.msra.mxu0 %v1881_v1  ;;  %1633 = vmatpush3.bf16.msra.mxu1 %v1895_v6 }
 0x449   : > { %1634 = vmatprep.subr.bf16.mxu1 %v1896_v7 }
 0x44b   : > { %1112 = vmatmul.mubr.bf16.vlgmr.msra.gmra.mxu0 %v982_v4 }
 0x44c   : > { %1635 = vmatpush3.bf16.msra.mxu1 %v1897_v8 }
 0x50b   : > { %v1113_v9 = vpop.f32.mrf.mxu0 }
 0x50c   : > { %1120 = vst [vmem:[%s2459_s27] sm:$0xff] %v1113_v9  ;;  %v1122_v12 = vpack.c.bf16 %v1113_v9, %v1113_v9 }
 0x50d   : > { %v1115_v10 = vpop.f32.mrf.mxu0 }
 0x50e   : > { %1121 = vst [vmem:[%s2459_s27 + $0x8] sm:$0xff] %v1115_v10  ;;  %v1123_v11 = vpack.c.bf16 %v1115_v10, %v1115_v10 }
 0x50f   : > { %v1117_v13 = vpop.f32.mrf.mxu0 }
 0x510   : > { %1284 = vmatprep.mubr.bf16.mxu1 %v1123_v11 }
 0x511   : > { %v1118_v14 = vpop.f32.mrf.mxu0  ;;  %1285 = vmatmul.mubr.bf16.vlgmr.msra.gmra.mxu1 %v1122_v12 }
 0x512   : > { %2069 = shalt.err (!%p2066_p9)
}
 0x513   : > { %s2070_s27 = scalar_lea.hbm %s1311_s30, 256  ;;  %s2074_s25 = scalar_lea.hbm %s2636_s18, 512 }
 0x514   : > { %p2071_p2 = scmp.ne.s32.totalorder %s1311_s30, %s2070_s27  ;;  %p2075_p7 = scmp.lt.s32.totalorder %s1311_s30, %s2636_s18 }
 0x515   : > { %p2076_p1 = scmp.lt.s32.totalorder %s2074_s25, %s2070_s27 }
 0x516   : > { %p2072_p12 = pnand %p2071_p2, %p2637_p11 }
 0x517   : > { %p2077_p10 = por %p2076_p1, %p2075_p7 }
 0x518   : > { %p2073_p3 = pneg %p2072_p12 }
 0x51a   : > { %p2078_p8 = pnand %p2077_p10, %p2073_p3 }
 0x51c   : > { %2081 = shalt.err (!%p2078_p8)
}
 0x51d   : > { %1769 = dma.vmem_to_hbm [thread:$0]  (%p2637_p11), %s1314_s0, 256, %s1311_s30, %s1294_s4  }
 0x51e   : > { %s1554_s13 = sshll.u32 %s2285_s11, 7  ;;  %s1329_s24 = sshll.u32 %s2461_s28, 4  ;;  %s2533_s24 = int_to_ptr.vmem [resolvable:$true] %s1329_s24 }
 0x51f   : > { %s2638_s16 = sld [smem:[#allocation33_spill]]  ;;  %s1299_s26 = scalar_lea.sflag [#allocation17], %s2436_s8 }
 0x520   : > { %s2082_s0 = scalar_lea.vmem %s2533_s24, 128  ;;  %s2180_s11 = smov [#allocation16]  }
 0x521   : > { %p2083_p0 = scmp.ne.s32.totalorder %s2533_s24, %s2082_s0  ;;  %s2086_s30 = sshll.u32 %s2180_s11, 4  ;;  %s2087_s30 = int_to_ptr.vmem [resolvable:$false] %s2086_s30 }
 0x522   : > { %s2088_s4 = scalar_lea.vmem %s2087_s30, 256  ;;  %p2089_p13 = scmp.lt.s32.totalorder %s2533_s24, %s2087_s30 }
 0x523   : > { %p2084_p6 = pnand %p2083_p0, %p2637_p11  ;;  %p2090_p4 = scmp.lt.s32.totalorder %s2088_s4, %s2082_s0 }
 0x525   : > { %s2531_s27 = scalar_lea.hbm %s2638_s16, %s1554_s13  ;;  %p2085_p5 = pneg %p2084_p6 }
 0x526   : > { %p2091_p9 = por %p2090_p4, %p2089_p13 }
 0x528   : > { %p2092_p2 = pnand %p2091_p9, %p2085_p5 }
 0x5d1   : > { %v1636_v15 = vpop.f32.mrf.mxu1 }
 0x5d3   : > { %v1637_v16 = vpop.f32.mrf.mxu1 }
 0x5d4   : > { %v1638_v17 = vadd.f32 %v1637_v16, %v1636_v15 }
 0x5d5   : > { %v1639_v18 = vpop.f32.mrf.mxu1 }
 0x5d6   : > { %1292 = vst [vmem:[%s2461_s28] sm:$0xff] %v1638_v17 }
 0x5d7   : > { %v1640_v19 = vpop.f32.mrf.mxu1 }
 0x5d8   : > { %2095 = shalt.err (!%p2092_p2)
}
 0x5d9   : > { %s2096_s28 = scalar_lea.hbm %s2531_s27, 128  ;;  %s2100_s25 = scalar_lea.hbm %s2638_s16, 256 }
 0x5da   : > { %p2097_p12 = scmp.ne.s32.totalorder %s2531_s27, %s2096_s28  ;;  %p2101_p1 = scmp.lt.s32.totalorder %s2531_s27, %s2638_s16 }
 0x5db   : > { %p2102_p10 = scmp.lt.s32.totalorder %s2100_s25, %s2096_s28 }
 0x5dc   : > { %p2098_p3 = pnand %p2097_p12, %p2637_p11 }
 0x5dd   : > { %p2103_p8 = por %p2102_p10, %p2101_p1 }
 0x5de   : > { %p2099_p7 = pneg %p2098_p3 }
 0x5e0   : > { %p2104_p0 = pnand %p2103_p8, %p2099_p7 }
 0x5e2   : > { %2107 = shalt.err (!%p2104_p0)
}
 0x5e3   : > { %1770 = dma.vmem_to_hbm [thread:$0]  (%p2637_p11), %s2533_s24, 128, %s2531_s27, %s1299_s26  }
 0x5e4 PF: > { %s2639_s6 = sld [smem:[#allocation25_spill]]  ;;  %p2642_p5 = scmp.ge.s32.totalorder %s2166_s23, 2 }
 0x5e5   : > { %s2640_s1 = sld [smem:[#allocation26_spill]] }
 0x5ea   : > { %s1344_s0 = sand.u32 1, %s2639_s6  }
 0x5eb   : > { %p2641_p6 = scmp.ne.s32.totalorder %s2640_s1, 0  ;;  %s1345_s11 = scalar_lea.sflag [#allocation6], %s1344_s0 }
 0x5ed   : > { %p1794_p13 = pnand %p2642_p5, %p2641_p6 }
 0x5ef   : > { %p1795_p4 = pneg %p1794_p13 }
 0x5f1   : > { %2145 = dma.done.wait (%p1795_p4), %s1345_s11, 256  }
 0x5f2   : > { %2147 = vsyncadd (%p1795_p4), %s1345_s11, 4294967040  ;;  %s1354_s30 = scalar_lea.sflag [#allocation17], %s1344_s0 }
 0x5f3   : > { %2149 = dma.done.wait (%p1795_p4), %s1354_s30, 128  }
 0x5f4   : > { %2151 = vsyncadd (%p1795_p4), %s1354_s30, 4294967168  ;;  %s2643_s15 = smov %s2382_s20  ;;  %p37_p11 = scmp.ge.s32.totalorder %s2372_s17, 4  }
 0x5f5   : > { %s2644_s20 = smov %s2158_s21  ;;  %s2645_s21 = smov %s2162_s22 }
 0x5f6   : > { %s2646_s22 = smov %s2643_s15  ;;  %s2647_s23 = smov %s2372_s17 }
 0x5f7   :  { %39 = sbr.rel (!%p37_p11) target bundleno = 18 (0x12), region = 168 }
 0x5fc   :  { %1359 = vsyncpa [#allocation5], 1 }
 0x5fd   :  { %1361 = vsyncpa [#allocation5 + $0x1], 1 }
 0x5fe   :  { %1362 = vsyncpa [#allocation8], 1 }
 0x5ff   :  { %1364 = vsyncpa [#allocation8 + $0x1], 1 }
 0x600   :  { %1365 = vsyncpa [#allocation11], 1 }
 0x601   :  { %1366 = vsyncpa [#allocation14], 1 }
 0x602   :  { %1367 = vsyncpa [#allocation6], 1 }
 0x603   :  { %1369 = vsyncpa [#allocation6 + $0x1], 1 }
 0x604   :  { %1370 = vsyncpa [#allocation17], 1 }
 0x605   :  { %1372 = vsyncpa [#allocation17 + $0x1], 1 }

</bundles_post_ra>
